<compile_context>
chip_gen: v5e
topology: v5e:2x2
jax: 0.10.0
libtpu: 0.0.40
codegen_flags: <defaults>
</compile_context>

<pallas_src>
import jax
import jax.numpy as jnp
from jax import lax
from jax.experimental import pallas as pl
from jax.experimental.pallas import tpu as pltpu

M_MARGIN = 0.15
GAMMA = 1.0
METRIC = "cosine"          # 'cosine' or 'euclidean'
_EPS = 1e-12               # matches torch F.normalize eps
_EPS2 = _EPS * _EPS
_LANE = 128


def _similarity_slice(a, inv_a, x_k):
    """Similarity of anchor (D, TB) against one pos/neg slice x_k (D, TB) -> (1, TB)."""
    if METRIC == "cosine":
        dot = jnp.sum(a * x_k, axis=0, keepdims=True)                       # (1, TB)
        inv_x = lax.rsqrt(jnp.maximum(jnp.sum(x_k * x_k, axis=0, keepdims=True), _EPS2))
        # fold both rsqrts into the (1, TB) scalar -> no (D, TB) normalize multiplies
        return dot * (inv_a * inv_x)
    # euclidean: 1 / (1 + ||a - x||)  (forward-only; no eps guard needed)
    diff = a - x_k
    return 1.0 / (1.0 + jnp.sqrt(jnp.sum(diff * diff, axis=0, keepdims=True)))


def _logsumexp_rows(rows):
    """Stable logsumexp over a static Python list of (1, TB) rows."""
    m = rows[0]
    for r in rows[1:]:
        m = jnp.maximum(m, r)
    s = jnp.exp(rows[0] - m)
    for r in rows[1:]:
        s = s + jnp.exp(r - m)
    return m + jnp.log(s)


def circle_loss_kernel(neg_w_ref, a_ref, p_ref, n_ref, w_ref, out_ref):
    # single f32 upcast per streamed slice (bf16 storage dtype supported)
    a = a_ref[...].astype(jnp.float32)                                      # (D, TB)
    if METRIC == "cosine":
        inv_a = lax.rsqrt(jnp.maximum(jnp.sum(a * a, axis=0, keepdims=True), _EPS2))
    else:
        inv_a = None

    neg_w = neg_w_ref[0, 0]                                                 # global mean(pos_weights)
    P = p_ref.shape[0]
    N = n_ref.shape[0]

    # ---- positive branch: stream one (D, TB) slice per k (P tiny, unrolled) ----
    logit_p_rows = []
    for k in range(P):
        sp_k = _similarity_slice(a, inv_a, p_ref[k].astype(jnp.float32))    # (1, TB)
        w_k = w_ref[pl.ds(k, 1), :].astype(jnp.float32)                     # (1, TB)
        ap_k = jnp.maximum((1.0 + M_MARGIN) - sp_k, 0.0)
        logit_k = -ap_k * (sp_k - (1.0 - M_MARGIN)) * w_k
        if GAMMA != 1.0:                                                    # static: drop mul at gamma==1
            logit_k = logit_k * GAMMA
        logit_p_rows.append(logit_k)
    lse_p = _logsumexp_rows(logit_p_rows)                                   # (1, TB)

    # ---- negative branch ----
    logit_n_rows = []
    for k in range(N):
        sn_k = _similarity_slice(a, inv_a, n_ref[k].astype(jnp.float32))    # (1, TB)
        an_k = jnp.maximum(sn_k + M_MARGIN, 0.0)
        logit_k = an_k * (sn_k - M_MARGIN) * neg_w
        if GAMMA != 1.0:
            logit_k = logit_k * GAMMA
        logit_n_rows.append(logit_k)
    lse_n = _logsumexp_rows(logit_n_rows)                                   # (1, TB)

    # stable softplus; per-example values, lane-dense output block
    z = lse_p + lse_n
    out_ref[...] = jnp.maximum(z, 0.0) + jnp.log1p(jnp.exp(-jnp.abs(z)))


def circle_loss(anchor, pos, neg, pos_weights, *, block_b=512):
    """anchor (B,D), pos (B,P,D), neg (B,N,D), pos_weights (B,P) -> scalar f32 loss.

    anchor/pos/neg may be bf16 (recommended at real sizes); the kernel upcasts once.
    """
    B, D = anchor.shape
    P = pos.shape[1]
    N = neg.shape[1]

    # global quantities (must NOT be computed per tile)
    neg_w = jnp.mean(pos_weights.astype(jnp.float32)).reshape(1, 1)

    # lane-dense layout: batch on the last (lane) axis
    a_t = jnp.transpose(anchor, (1, 0))            # (D, B)
    p_t = jnp.transpose(pos, (1, 2, 0))            # (P, D, B)
    n_t = jnp.transpose(neg, (1, 2, 0))            # (N, D, B)
    w_t = jnp.transpose(pos_weights, (1, 0))       # (P, B)

    # batch tile: lane-multiple, capped (~512 fits v7x's 64 MiB VMEM comfortably)
    tb = max(_LANE, min(block_b, ((B + _LANE - 1) // _LANE) * _LANE))
    tb = ((tb + _LANE - 1) // _LANE) * _LANE
    b_pad = ((B + tb - 1) // tb) * tb
    if b_pad != B:
        padc = b_pad - B
        a_t = jnp.pad(a_t, ((0, 0), (0, padc)))
        p_t = jnp.pad(p_t, ((0, 0), (0, 0), (0, padc)))
        n_t = jnp.pad(n_t, ((0, 0), (0, 0), (0, padc)))
        w_t = jnp.pad(w_t, ((0, 0), (0, padc)))
    grid = (b_pad // tb,)

    # explicit scoped-VMEM budget from the tile footprint (double-buffered
    # inputs + f32 working slices), clamped to [32 MiB, 64 MiB] so it is safe
    # on every generation (v7x physical VMEM is 64 MiB).
    in_item = max(jnp.dtype(anchor.dtype).itemsize,
                  jnp.dtype(pos.dtype).itemsize,
                  jnp.dtype(neg.dtype).itemsize)
    w_item = jnp.dtype(pos_weights.dtype).itemsize
    tile_bytes = (D + P * D + N * D) * tb * in_item + P * tb * w_item + tb * 4
    vmem_need = 2 * tile_bytes + 8 * D * tb * 4
    vmem_limit = int(min(max(2 * vmem_need, 32 << 20), 64 << 20))

    # advisory cost estimate for XLA scheduling around the custom call
    flops = b_pad * ((P + N + 1) * D * 4 + (P + N) * 12)
    transcendentals = b_pad * (2 * (P + N) + 4)
    bytes_accessed = (D * b_pad * in_item + (P + N) * D * b_pad * in_item
                      + P * b_pad * w_item + b_pad * 4 + 4)

    out = pl.pallas_call(
        circle_loss_kernel,
        out_shape=jax.ShapeDtypeStruct((1, b_pad), jnp.float32),
        grid_spec=pltpu.PrefetchScalarGridSpec(
            num_scalar_prefetch=0,
            grid=grid,
            in_specs=[
                pl.BlockSpec(memory_space=pltpu.MemorySpace.SMEM),      # neg_w (1,1)
                pl.BlockSpec((D, tb), lambda i: (0, i)),                # anchor (D, B)
                pl.BlockSpec((P, D, tb), lambda i: (0, 0, i)),          # pos (P, D, B)
                pl.BlockSpec((N, D, tb), lambda i: (0, 0, i)),          # neg (N, D, B)
                pl.BlockSpec((P, tb), lambda i: (0, i)),                # weights (P, B)
            ],
            out_specs=pl.BlockSpec((1, tb), lambda i: (0, i)),          # per-example softplus
        ),
        compiler_params=pltpu.CompilerParams(
            dimension_semantics=("parallel",),   # both TCs on v7x take tiles
            vmem_limit_bytes=vmem_limit,
        ),
        cost_estimate=pl.CostEstimate(
            flops=flops, transcendentals=transcendentals, bytes_accessed=bytes_accessed),
        # TODO(synk): on v5e, consider pipeline_mode=pl.Buffered(3) on the
        # pos/neg specs if an xprof trace shows exposed DMA.
    )(neg_w, a_t, p_t, n_t, w_t)

    # final mean over the real (unpadded) batch: one tiny XLA reduce
    return jnp.sum(out[0, :B]) / B


def circle_loss_ref(anchor, pos, neg, pos_weights, m=M_MARGIN, gamma=GAMMA, metric=METRIC):
    # pure-JAX reference mirroring the PyTorch forward (for verification)
    anchor = anchor.astype(jnp.float32)
    pos = pos.astype(jnp.float32)
    neg = neg.astype(jnp.float32)
    pos_weights = pos_weights.astype(jnp.float32)

    def sim(a, x):
        if metric == "cosine":
            a_n = a / jnp.maximum(jnp.linalg.norm(a, axis=-1, keepdims=True), _EPS)
            x_n = x / jnp.maximum(jnp.linalg.norm(x, axis=-1, keepdims=True), _EPS)
            return jnp.einsum("bd,bkd->bk", a_n, x_n)
        d = jnp.sqrt(jnp.sum((a[:, None, :] - x) ** 2, axis=-1))
        return 1.0 / (1.0 + d)

    sp = sim(anchor, pos)
    ap = jnp.maximum(-sp + 1.0 + m, 0.0)
    logit_p = -ap * (sp - (1.0 - m)) * gamma * pos_weights
    lse_p = jax.scipy.special.logsumexp(logit_p, axis=-1)

    sn = sim(anchor, neg)
    an = jnp.maximum(sn + m, 0.0)
    logit_n = an * (sn - m) * gamma * jnp.mean(pos_weights)
    lse_n = jax.scipy.special.logsumexp(logit_n, axis=-1)

    return jnp.mean(jax.nn.softplus(lse_p + lse_n))


if __name__ == "__main__":
    B, D, P, N = 8, 32, 4, 6
    key = jax.random.PRNGKey(0)
    k1, k2, k3, k4 = jax.random.split(key, 4)
    anchor = jax.random.normal(k1, (B, D), dtype=jnp.float32)
    pos = jax.random.normal(k2, (B, P, D), dtype=jnp.float32)
    neg = jax.random.normal(k3, (B, N, D), dtype=jnp.float32)
    pos_weights = jax.random.uniform(k4, (B, P), dtype=jnp.float32, minval=0.5, maxval=1.5)

    loss = jax.block_until_ready(circle_loss(anchor, pos, neg, pos_weights))
    ref = jax.block_until_ready(circle_loss_ref(anchor, pos, neg, pos_weights))
    assert jnp.allclose(loss, ref, rtol=1e-5, atol=1e-5), (loss, ref)

    # bf16 storage-dtype contract (kernel upcasts once per streamed slice)
    loss_bf16 = jax.block_until_ready(
        circle_loss(anchor.astype(jnp.bfloat16), pos.astype(jnp.bfloat16),
                    neg.astype(jnp.bfloat16), pos_weights))
    assert jnp.allclose(loss_bf16, ref, rtol=5e-2, atol=5e-2), (loss_bf16, ref)

    print("KERNEL_OK")
</pallas_src>

<mosaic_0001>
module attributes {stable_mosaic.version = 11 : i64} {
  func.func @circle_loss_kernel(%arg0: i32, %arg1: memref<1x1xf32, #tpu.memory_space<smem>>, %arg2: memref<32x128xf32, #tpu.memory_space<vmem>>, %arg3: memref<4x32x128xf32, #tpu.memory_space<vmem>>, %arg4: memref<6x32x128xf32, #tpu.memory_space<vmem>>, %arg5: memref<4x128xf32, #tpu.memory_space<vmem>>, %arg6: memref<1x128xf32, #tpu.memory_space<vmem>>) attributes {dimension_semantics = [#tpu.dimension_semantics<parallel>], iteration_bounds = array<i64: 1>, scalar_prefetch = 0 : i64, scratch_operands = 0 : i64, tpu.core_type = #tpu.core_type<tc>, window_params = [{transform_indices = @transform_0, window_bounds = array<i64: 1, 1>}, {transform_indices = @transform_1, window_bounds = array<i64: 32, 128>}, {transform_indices = @transform_2, window_bounds = array<i64: 4, 32, 128>}, {transform_indices = @transform_3, window_bounds = array<i64: 6, 32, 128>}, {transform_indices = @transform_4, window_bounds = array<i64: 4, 128>}, {transform_indices = @transform_5, window_bounds = array<i64: 1, 128>}]} {
    %c0 = arith.constant 0 : index
    %c0_0 = arith.constant 0 : index
    %0 = vector.load %arg2[%c0, %c0_0] : memref<32x128xf32, #tpu.memory_space<vmem>>, vector<32x128xf32>
    %1 = arith.mulf %0, %0 : vector<32x128xf32>
    %cst = arith.constant dense<0.000000e+00> : vector<128xf32>
    %2 = vector.multi_reduction <add>, %1, %cst [0] : vector<32x128xf32> to vector<128xf32>
    %3 = vector.shape_cast %2 : vector<128xf32> to vector<1x128xf32>
    %cst_1 = arith.constant 1.000000e-24 : f32
    %4 = vector.broadcast %cst_1 : f32 to vector<1x128xf32>
    %5 = arith.maximumf %3, %4 : vector<1x128xf32>
    %6 = math.rsqrt %5 : vector<1x128xf32>
    %c0_2 = arith.constant 0 : index
    %c0_3 = arith.constant 0 : index
    %7 = memref.load %arg1[%c0_2, %c0_3] : memref<1x1xf32, #tpu.memory_space<smem>>
    %c0_4 = arith.constant 0 : index
    %c0_5 = arith.constant 0 : index
    %c0_6 = arith.constant 0 : index
    %8 = vector.load %arg3[%c0_4, %c0_5, %c0_6] : memref<4x32x128xf32, #tpu.memory_space<vmem>>, vector<1x32x128xf32>
    %9 = vector.shape_cast %8 : vector<1x32x128xf32> to vector<32x128xf32>
    %10 = arith.mulf %0, %9 : vector<32x128xf32>
    %cst_7 = arith.constant dense<0.000000e+00> : vector<128xf32>
    %11 = vector.multi_reduction <add>, %10, %cst_7 [0] : vector<32x128xf32> to vector<128xf32>
    %12 = vector.shape_cast %11 : vector<128xf32> to vector<1x128xf32>
    %13 = arith.mulf %9, %9 : vector<32x128xf32>
    %cst_8 = arith.constant dense<0.000000e+00> : vector<128xf32>
    %14 = vector.multi_reduction <add>, %13, %cst_8 [0] : vector<32x128xf32> to vector<128xf32>
    %15 = vector.shape_cast %14 : vector<128xf32> to vector<1x128xf32>
    %cst_9 = arith.constant 1.000000e-24 : f32
    %16 = vector.broadcast %cst_9 : f32 to vector<1x128xf32>
    %17 = arith.maximumf %15, %16 : vector<1x128xf32>
    %18 = math.rsqrt %17 : vector<1x128xf32>
    %19 = arith.mulf %6, %18 : vector<1x128xf32>
    %20 = arith.mulf %12, %19 : vector<1x128xf32>
    %c0_10 = arith.constant 0 : index
    %c0_11 = arith.constant 0 : index
    %21 = vector.load %arg5[%c0_10, %c0_11] : memref<4x128xf32, #tpu.memory_space<vmem>>, vector<1x128xf32>
    %cst_12 = arith.constant 1.150000e+00 : f32
    %22 = vector.broadcast %cst_12 : f32 to vector<1x128xf32>
    %23 = arith.subf %22, %20 : vector<1x128xf32>
    %cst_13 = arith.constant 0.000000e+00 : f32
    %24 = vector.broadcast %cst_13 : f32 to vector<1x128xf32>
    %25 = arith.maximumf %23, %24 : vector<1x128xf32>
    %cst_14 = arith.constant 0.000000e+00 : f32
    %26 = vector.broadcast %cst_14 : f32 to vector<1x128xf32>
    %27 = arith.subf %26, %25 : vector<1x128xf32>
    %cst_15 = arith.constant 8.500000e-01 : f32
    %28 = vector.broadcast %cst_15 : f32 to vector<1x128xf32>
    %29 = arith.subf %20, %28 : vector<1x128xf32>
    %30 = arith.mulf %27, %29 : vector<1x128xf32>
    %31 = arith.mulf %30, %21 : vector<1x128xf32>
    %c1 = arith.constant 1 : index
    %c0_16 = arith.constant 0 : index
    %c0_17 = arith.constant 0 : index
    %32 = vector.load %arg3[%c1, %c0_16, %c0_17] : memref<4x32x128xf32, #tpu.memory_space<vmem>>, vector<1x32x128xf32>
    %33 = vector.shape_cast %32 : vector<1x32x128xf32> to vector<32x128xf32>
    %34 = arith.mulf %0, %33 : vector<32x128xf32>
    %cst_18 = arith.constant dense<0.000000e+00> : vector<128xf32>
    %35 = vector.multi_reduction <add>, %34, %cst_18 [0] : vector<32x128xf32> to vector<128xf32>
    %36 = vector.shape_cast %35 : vector<128xf32> to vector<1x128xf32>
    %37 = arith.mulf %33, %33 : vector<32x128xf32>
    %cst_19 = arith.constant dense<0.000000e+00> : vector<128xf32>
    %38 = vector.multi_reduction <add>, %37, %cst_19 [0] : vector<32x128xf32> to vector<128xf32>
    %39 = vector.shape_cast %38 : vector<128xf32> to vector<1x128xf32>
    %cst_20 = arith.constant 1.000000e-24 : f32
    %40 = vector.broadcast %cst_20 : f32 to vector<1x128xf32>
    %41 = arith.maximumf %39, %40 : vector<1x128xf32>
    %42 = math.rsqrt %41 : vector<1x128xf32>
    %43 = arith.mulf %6, %42 : vector<1x128xf32>
    %44 = arith.mulf %36, %43 : vector<1x128xf32>
    %c1_21 = arith.constant 1 : index
    %c0_22 = arith.constant 0 : index
    %45 = vector.load %arg5[%c1_21, %c0_22] : memref<4x128xf32, #tpu.memory_space<vmem>>, vector<1x128xf32>
    %cst_23 = arith.constant 1.150000e+00 : f32
    %46 = vector.broadcast %cst_23 : f32 to vector<1x128xf32>
    %47 = arith.subf %46, %44 : vector<1x128xf32>
    %cst_24 = arith.constant 0.000000e+00 : f32
    %48 = vector.broadcast %cst_24 : f32 to vector<1x128xf32>
    %49 = arith.maximumf %47, %48 : vector<1x128xf32>
    %cst_25 = arith.constant 0.000000e+00 : f32
    %50 = vector.broadcast %cst_25 : f32 to vector<1x128xf32>
    %51 = arith.subf %50, %49 : vector<1x128xf32>
    %cst_26 = arith.constant 8.500000e-01 : f32
    %52 = vector.broadcast %cst_26 : f32 to vector<1x128xf32>
    %53 = arith.subf %44, %52 : vector<1x128xf32>
    %54 = arith.mulf %51, %53 : vector<1x128xf32>
    %55 = arith.mulf %54, %45 : vector<1x128xf32>
    %c2 = arith.constant 2 : index
    %c0_27 = arith.constant 0 : index
    %c0_28 = arith.constant 0 : index
    %56 = vector.load %arg3[%c2, %c0_27, %c0_28] : memref<4x32x128xf32, #tpu.memory_space<vmem>>, vector<1x32x128xf32>
    %57 = vector.shape_cast %56 : vector<1x32x128xf32> to vector<32x128xf32>
    %58 = arith.mulf %0, %57 : vector<32x128xf32>
    %cst_29 = arith.constant dense<0.000000e+00> : vector<128xf32>
    %59 = vector.multi_reduction <add>, %58, %cst_29 [0] : vector<32x128xf32> to vector<128xf32>
    %60 = vector.shape_cast %59 : vector<128xf32> to vector<1x128xf32>
    %61 = arith.mulf %57, %57 : vector<32x128xf32>
    %cst_30 = arith.constant dense<0.000000e+00> : vector<128xf32>
    %62 = vector.multi_reduction <add>, %61, %cst_30 [0] : vector<32x128xf32> to vector<128xf32>
    %63 = vector.shape_cast %62 : vector<128xf32> to vector<1x128xf32>
    %cst_31 = arith.constant 1.000000e-24 : f32
    %64 = vector.broadcast %cst_31 : f32 to vector<1x128xf32>
    %65 = arith.maximumf %63, %64 : vector<1x128xf32>
    %66 = math.rsqrt %65 : vector<1x128xf32>
    %67 = arith.mulf %6, %66 : vector<1x128xf32>
    %68 = arith.mulf %60, %67 : vector<1x128xf32>
    %c2_32 = arith.constant 2 : index
    %c0_33 = arith.constant 0 : index
    %69 = vector.load %arg5[%c2_32, %c0_33] : memref<4x128xf32, #tpu.memory_space<vmem>>, vector<1x128xf32>
    %cst_34 = arith.constant 1.150000e+00 : f32
    %70 = vector.broadcast %cst_34 : f32 to vector<1x128xf32>
    %71 = arith.subf %70, %68 : vector<1x128xf32>
    %cst_35 = arith.constant 0.000000e+00 : f32
    %72 = vector.broadcast %cst_35 : f32 to vector<1x128xf32>
    %73 = arith.maximumf %71, %72 : vector<1x128xf32>
    %cst_36 = arith.constant 0.000000e+00 : f32
    %74 = vector.broadcast %cst_36 : f32 to vector<1x128xf32>
    %75 = arith.subf %74, %73 : vector<1x128xf32>
    %cst_37 = arith.constant 8.500000e-01 : f32
    %76 = vector.broadcast %cst_37 : f32 to vector<1x128xf32>
    %77 = arith.subf %68, %76 : vector<1x128xf32>
    %78 = arith.mulf %75, %77 : vector<1x128xf32>
    %79 = arith.mulf %78, %69 : vector<1x128xf32>
    %c3 = arith.constant 3 : index
    %c0_38 = arith.constant 0 : index
    %c0_39 = arith.constant 0 : index
    %80 = vector.load %arg3[%c3, %c0_38, %c0_39] : memref<4x32x128xf32, #tpu.memory_space<vmem>>, vector<1x32x128xf32>
    %81 = vector.shape_cast %80 : vector<1x32x128xf32> to vector<32x128xf32>
    %82 = arith.mulf %0, %81 : vector<32x128xf32>
    %cst_40 = arith.constant dense<0.000000e+00> : vector<128xf32>
    %83 = vector.multi_reduction <add>, %82, %cst_40 [0] : vector<32x128xf32> to vector<128xf32>
    %84 = vector.shape_cast %83 : vector<128xf32> to vector<1x128xf32>
    %85 = arith.mulf %81, %81 : vector<32x128xf32>
    %cst_41 = arith.constant dense<0.000000e+00> : vector<128xf32>
    %86 = vector.multi_reduction <add>, %85, %cst_41 [0] : vector<32x128xf32> to vector<128xf32>
    %87 = vector.shape_cast %86 : vector<128xf32> to vector<1x128xf32>
    %cst_42 = arith.constant 1.000000e-24 : f32
    %88 = vector.broadcast %cst_42 : f32 to vector<1x128xf32>
    %89 = arith.maximumf %87, %88 : vector<1x128xf32>
    %90 = math.rsqrt %89 : vector<1x128xf32>
    %91 = arith.mulf %6, %90 : vector<1x128xf32>
    %92 = arith.mulf %84, %91 : vector<1x128xf32>
    %c3_43 = arith.constant 3 : index
    %c0_44 = arith.constant 0 : index
    %93 = vector.load %arg5[%c3_43, %c0_44] : memref<4x128xf32, #tpu.memory_space<vmem>>, vector<1x128xf32>
    %cst_45 = arith.constant 1.150000e+00 : f32
    %94 = vector.broadcast %cst_45 : f32 to vector<1x128xf32>
    %95 = arith.subf %94, %92 : vector<1x128xf32>
    %cst_46 = arith.constant 0.000000e+00 : f32
    %96 = vector.broadcast %cst_46 : f32 to vector<1x128xf32>
    %97 = arith.maximumf %95, %96 : vector<1x128xf32>
    %cst_47 = arith.constant 0.000000e+00 : f32
    %98 = vector.broadcast %cst_47 : f32 to vector<1x128xf32>
    %99 = arith.subf %98, %97 : vector<1x128xf32>
    %cst_48 = arith.constant 8.500000e-01 : f32
    %100 = vector.broadcast %cst_48 : f32 to vector<1x128xf32>
    %101 = arith.subf %92, %100 : vector<1x128xf32>
    %102 = arith.mulf %99, %101 : vector<1x128xf32>
    %103 = arith.mulf %102, %93 : vector<1x128xf32>
    %104 = arith.maximumf %31, %55 : vector<1x128xf32>
    %105 = arith.maximumf %104, %79 : vector<1x128xf32>
    %106 = arith.maximumf %105, %103 : vector<1x128xf32>
    %107 = arith.subf %31, %106 : vector<1x128xf32>
    %108 = math.exp %107 : vector<1x128xf32>
    %109 = arith.subf %55, %106 : vector<1x128xf32>
    %110 = math.exp %109 : vector<1x128xf32>
    %111 = arith.addf %108, %110 : vector<1x128xf32>
    %112 = arith.subf %79, %106 : vector<1x128xf32>
    %113 = math.exp %112 : vector<1x128xf32>
    %114 = arith.addf %111, %113 : vector<1x128xf32>
    %115 = arith.subf %103, %106 : vector<1x128xf32>
    %116 = math.exp %115 : vector<1x128xf32>
    %117 = arith.addf %114, %116 : vector<1x128xf32>
    %118 = math.log %117 : vector<1x128xf32>
    %119 = arith.addf %106, %118 : vector<1x128xf32>
    %c0_49 = arith.constant 0 : index
    %c0_50 = arith.constant 0 : index
    %c0_51 = arith.constant 0 : index
    %120 = vector.load %arg4[%c0_49, %c0_50, %c0_51] : memref<6x32x128xf32, #tpu.memory_space<vmem>>, vector<1x32x128xf32>
    %121 = vector.shape_cast %120 : vector<1x32x128xf32> to vector<32x128xf32>
    %122 = arith.mulf %0, %121 : vector<32x128xf32>
    %cst_52 = arith.constant dense<0.000000e+00> : vector<128xf32>
    %123 = vector.multi_reduction <add>, %122, %cst_52 [0] : vector<32x128xf32> to vector<128xf32>
    %124 = vector.shape_cast %123 : vector<128xf32> to vector<1x128xf32>
    %125 = arith.mulf %121, %121 : vector<32x128xf32>
    %cst_53 = arith.constant dense<0.000000e+00> : vector<128xf32>
    %126 = vector.multi_reduction <add>, %125, %cst_53 [0] : vector<32x128xf32> to vector<128xf32>
    %127 = vector.shape_cast %126 : vector<128xf32> to vector<1x128xf32>
    %cst_54 = arith.constant 1.000000e-24 : f32
    %128 = vector.broadcast %cst_54 : f32 to vector<1x128xf32>
    %129 = arith.maximumf %127, %128 : vector<1x128xf32>
    %130 = math.rsqrt %129 : vector<1x128xf32>
    %131 = arith.mulf %6, %130 : vector<1x128xf32>
    %132 = arith.mulf %124, %131 : vector<1x128xf32>
    %cst_55 = arith.constant 1.500000e-01 : f32
    %133 = vector.broadcast %cst_55 : f32 to vector<1x128xf32>
    %134 = arith.addf %132, %133 : vector<1x128xf32>
    %cst_56 = arith.constant 0.000000e+00 : f32
    %135 = vector.broadcast %cst_56 : f32 to vector<1x128xf32>
    %136 = arith.maximumf %134, %135 : vector<1x128xf32>
    %cst_57 = arith.constant 1.500000e-01 : f32
    %137 = vector.broadcast %cst_57 : f32 to vector<1x128xf32>
    %138 = arith.subf %132, %137 : vector<1x128xf32>
    %139 = arith.mulf %136, %138 : vector<1x128xf32>
    %140 = vector.broadcast %7 : f32 to vector<1x128xf32>
    %141 = arith.mulf %139, %140 : vector<1x128xf32>
    %c1_58 = arith.constant 1 : index
    %c0_59 = arith.constant 0 : index
    %c0_60 = arith.constant 0 : index
    %142 = vector.load %arg4[%c1_58, %c0_59, %c0_60] : memref<6x32x128xf32, #tpu.memory_space<vmem>>, vector<1x32x128xf32>
    %143 = vector.shape_cast %142 : vector<1x32x128xf32> to vector<32x128xf32>
    %144 = arith.mulf %0, %143 : vector<32x128xf32>
    %cst_61 = arith.constant dense<0.000000e+00> : vector<128xf32>
    %145 = vector.multi_reduction <add>, %144, %cst_61 [0] : vector<32x128xf32> to vector<128xf32>
    %146 = vector.shape_cast %145 : vector<128xf32> to vector<1x128xf32>
    %147 = arith.mulf %143, %143 : vector<32x128xf32>
    %cst_62 = arith.constant dense<0.000000e+00> : vector<128xf32>
    %148 = vector.multi_reduction <add>, %147, %cst_62 [0] : vector<32x128xf32> to vector<128xf32>
    %149 = vector.shape_cast %148 : vector<128xf32> to vector<1x128xf32>
    %cst_63 = arith.constant 1.000000e-24 : f32
    %150 = vector.broadcast %cst_63 : f32 to vector<1x128xf32>
    %151 = arith.maximumf %149, %150 : vector<1x128xf32>
    %152 = math.rsqrt %151 : vector<1x128xf32>
    %153 = arith.mulf %6, %152 : vector<1x128xf32>
    %154 = arith.mulf %146, %153 : vector<1x128xf32>
    %cst_64 = arith.constant 1.500000e-01 : f32
    %155 = vector.broadcast %cst_64 : f32 to vector<1x128xf32>
    %156 = arith.addf %154, %155 : vector<1x128xf32>
    %cst_65 = arith.constant 0.000000e+00 : f32
    %157 = vector.broadcast %cst_65 : f32 to vector<1x128xf32>
    %158 = arith.maximumf %156, %157 : vector<1x128xf32>
    %cst_66 = arith.constant 1.500000e-01 : f32
    %159 = vector.broadcast %cst_66 : f32 to vector<1x128xf32>
    %160 = arith.subf %154, %159 : vector<1x128xf32>
    %161 = arith.mulf %158, %160 : vector<1x128xf32>
    %162 = vector.broadcast %7 : f32 to vector<1x128xf32>
    %163 = arith.mulf %161, %162 : vector<1x128xf32>
    %c2_67 = arith.constant 2 : index
    %c0_68 = arith.constant 0 : index
    %c0_69 = arith.constant 0 : index
    %164 = vector.load %arg4[%c2_67, %c0_68, %c0_69] : memref<6x32x128xf32, #tpu.memory_space<vmem>>, vector<1x32x128xf32>
    %165 = vector.shape_cast %164 : vector<1x32x128xf32> to vector<32x128xf32>
    %166 = arith.mulf %0, %165 : vector<32x128xf32>
    %cst_70 = arith.constant dense<0.000000e+00> : vector<128xf32>
    %167 = vector.multi_reduction <add>, %166, %cst_70 [0] : vector<32x128xf32> to vector<128xf32>
    %168 = vector.shape_cast %167 : vector<128xf32> to vector<1x128xf32>
    %169 = arith.mulf %165, %165 : vector<32x128xf32>
    %cst_71 = arith.constant dense<0.000000e+00> : vector<128xf32>
    %170 = vector.multi_reduction <add>, %169, %cst_71 [0] : vector<32x128xf32> to vector<128xf32>
    %171 = vector.shape_cast %170 : vector<128xf32> to vector<1x128xf32>
    %cst_72 = arith.constant 1.000000e-24 : f32
    %172 = vector.broadcast %cst_72 : f32 to vector<1x128xf32>
    %173 = arith.maximumf %171, %172 : vector<1x128xf32>
    %174 = math.rsqrt %173 : vector<1x128xf32>
    %175 = arith.mulf %6, %174 : vector<1x128xf32>
    %176 = arith.mulf %168, %175 : vector<1x128xf32>
    %cst_73 = arith.constant 1.500000e-01 : f32
    %177 = vector.broadcast %cst_73 : f32 to vector<1x128xf32>
    %178 = arith.addf %176, %177 : vector<1x128xf32>
    %cst_74 = arith.constant 0.000000e+00 : f32
    %179 = vector.broadcast %cst_74 : f32 to vector<1x128xf32>
    %180 = arith.maximumf %178, %179 : vector<1x128xf32>
    %cst_75 = arith.constant 1.500000e-01 : f32
    %181 = vector.broadcast %cst_75 : f32 to vector<1x128xf32>
    %182 = arith.subf %176, %181 : vector<1x128xf32>
    %183 = arith.mulf %180, %182 : vector<1x128xf32>
    %184 = vector.broadcast %7 : f32 to vector<1x128xf32>
    %185 = arith.mulf %183, %184 : vector<1x128xf32>
    %c3_76 = arith.constant 3 : index
    %c0_77 = arith.constant 0 : index
    %c0_78 = arith.constant 0 : index
    %186 = vector.load %arg4[%c3_76, %c0_77, %c0_78] : memref<6x32x128xf32, #tpu.memory_space<vmem>>, vector<1x32x128xf32>
    %187 = vector.shape_cast %186 : vector<1x32x128xf32> to vector<32x128xf32>
    %188 = arith.mulf %0, %187 : vector<32x128xf32>
    %cst_79 = arith.constant dense<0.000000e+00> : vector<128xf32>
    %189 = vector.multi_reduction <add>, %188, %cst_79 [0] : vector<32x128xf32> to vector<128xf32>
    %190 = vector.shape_cast %189 : vector<128xf32> to vector<1x128xf32>
    %191 = arith.mulf %187, %187 : vector<32x128xf32>
    %cst_80 = arith.constant dense<0.000000e+00> : vector<128xf32>
    %192 = vector.multi_reduction <add>, %191, %cst_80 [0] : vector<32x128xf32> to vector<128xf32>
    %193 = vector.shape_cast %192 : vector<128xf32> to vector<1x128xf32>
    %cst_81 = arith.constant 1.000000e-24 : f32
    %194 = vector.broadcast %cst_81 : f32 to vector<1x128xf32>
    %195 = arith.maximumf %193, %194 : vector<1x128xf32>
    %196 = math.rsqrt %195 : vector<1x128xf32>
    %197 = arith.mulf %6, %196 : vector<1x128xf32>
    %198 = arith.mulf %190, %197 : vector<1x128xf32>
    %cst_82 = arith.constant 1.500000e-01 : f32
    %199 = vector.broadcast %cst_82 : f32 to vector<1x128xf32>
    %200 = arith.addf %198, %199 : vector<1x128xf32>
    %cst_83 = arith.constant 0.000000e+00 : f32
    %201 = vector.broadcast %cst_83 : f32 to vector<1x128xf32>
    %202 = arith.maximumf %200, %201 : vector<1x128xf32>
    %cst_84 = arith.constant 1.500000e-01 : f32
    %203 = vector.broadcast %cst_84 : f32 to vector<1x128xf32>
    %204 = arith.subf %198, %203 : vector<1x128xf32>
    %205 = arith.mulf %202, %204 : vector<1x128xf32>
    %206 = vector.broadcast %7 : f32 to vector<1x128xf32>
    %207 = arith.mulf %205, %206 : vector<1x128xf32>
    %c4 = arith.constant 4 : index
    %c0_85 = arith.constant 0 : index
    %c0_86 = arith.constant 0 : index
    %208 = vector.load %arg4[%c4, %c0_85, %c0_86] : memref<6x32x128xf32, #tpu.memory_space<vmem>>, vector<1x32x128xf32>
    %209 = vector.shape_cast %208 : vector<1x32x128xf32> to vector<32x128xf32>
    %210 = arith.mulf %0, %209 : vector<32x128xf32>
    %cst_87 = arith.constant dense<0.000000e+00> : vector<128xf32>
    %211 = vector.multi_reduction <add>, %210, %cst_87 [0] : vector<32x128xf32> to vector<128xf32>
    %212 = vector.shape_cast %211 : vector<128xf32> to vector<1x128xf32>
    %213 = arith.mulf %209, %209 : vector<32x128xf32>
    %cst_88 = arith.constant dense<0.000000e+00> : vector<128xf32>
    %214 = vector.multi_reduction <add>, %213, %cst_88 [0] : vector<32x128xf32> to vector<128xf32>
    %215 = vector.shape_cast %214 : vector<128xf32> to vector<1x128xf32>
    %cst_89 = arith.constant 1.000000e-24 : f32
    %216 = vector.broadcast %cst_89 : f32 to vector<1x128xf32>
    %217 = arith.maximumf %215, %216 : vector<1x128xf32>
    %218 = math.rsqrt %217 : vector<1x128xf32>
    %219 = arith.mulf %6, %218 : vector<1x128xf32>
    %220 = arith.mulf %212, %219 : vector<1x128xf32>
    %cst_90 = arith.constant 1.500000e-01 : f32
    %221 = vector.broadcast %cst_90 : f32 to vector<1x128xf32>
    %222 = arith.addf %220, %221 : vector<1x128xf32>
    %cst_91 = arith.constant 0.000000e+00 : f32
    %223 = vector.broadcast %cst_91 : f32 to vector<1x128xf32>
    %224 = arith.maximumf %222, %223 : vector<1x128xf32>
    %cst_92 = arith.constant 1.500000e-01 : f32
    %225 = vector.broadcast %cst_92 : f32 to vector<1x128xf32>
    %226 = arith.subf %220, %225 : vector<1x128xf32>
    %227 = arith.mulf %224, %226 : vector<1x128xf32>
    %228 = vector.broadcast %7 : f32 to vector<1x128xf32>
    %229 = arith.mulf %227, %228 : vector<1x128xf32>
    %c5 = arith.constant 5 : index
    %c0_93 = arith.constant 0 : index
    %c0_94 = arith.constant 0 : index
    %230 = vector.load %arg4[%c5, %c0_93, %c0_94] : memref<6x32x128xf32, #tpu.memory_space<vmem>>, vector<1x32x128xf32>
    %231 = vector.shape_cast %230 : vector<1x32x128xf32> to vector<32x128xf32>
    %232 = arith.mulf %0, %231 : vector<32x128xf32>
    %cst_95 = arith.constant dense<0.000000e+00> : vector<128xf32>
    %233 = vector.multi_reduction <add>, %232, %cst_95 [0] : vector<32x128xf32> to vector<128xf32>
    %234 = vector.shape_cast %233 : vector<128xf32> to vector<1x128xf32>
    %235 = arith.mulf %231, %231 : vector<32x128xf32>
    %cst_96 = arith.constant dense<0.000000e+00> : vector<128xf32>
    %236 = vector.multi_reduction <add>, %235, %cst_96 [0] : vector<32x128xf32> to vector<128xf32>
    %237 = vector.shape_cast %236 : vector<128xf32> to vector<1x128xf32>
    %cst_97 = arith.constant 1.000000e-24 : f32
    %238 = vector.broadcast %cst_97 : f32 to vector<1x128xf32>
    %239 = arith.maximumf %237, %238 : vector<1x128xf32>
    %240 = math.rsqrt %239 : vector<1x128xf32>
    %241 = arith.mulf %6, %240 : vector<1x128xf32>
    %242 = arith.mulf %234, %241 : vector<1x128xf32>
    %cst_98 = arith.constant 1.500000e-01 : f32
    %243 = vector.broadcast %cst_98 : f32 to vector<1x128xf32>
    %244 = arith.addf %242, %243 : vector<1x128xf32>
    %cst_99 = arith.constant 0.000000e+00 : f32
    %245 = vector.broadcast %cst_99 : f32 to vector<1x128xf32>
    %246 = arith.maximumf %244, %245 : vector<1x128xf32>
    %cst_100 = arith.constant 1.500000e-01 : f32
    %247 = vector.broadcast %cst_100 : f32 to vector<1x128xf32>
    %248 = arith.subf %242, %247 : vector<1x128xf32>
    %249 = arith.mulf %246, %248 : vector<1x128xf32>
    %250 = vector.broadcast %7 : f32 to vector<1x128xf32>
    %251 = arith.mulf %249, %250 : vector<1x128xf32>
    %252 = arith.maximumf %141, %163 : vector<1x128xf32>
    %253 = arith.maximumf %252, %185 : vector<1x128xf32>
    %254 = arith.maximumf %253, %207 : vector<1x128xf32>
    %255 = arith.maximumf %254, %229 : vector<1x128xf32>
    %256 = arith.maximumf %255, %251 : vector<1x128xf32>
    %257 = arith.subf %141, %256 : vector<1x128xf32>
    %258 = math.exp %257 : vector<1x128xf32>
    %259 = arith.subf %163, %256 : vector<1x128xf32>
    %260 = math.exp %259 : vector<1x128xf32>
    %261 = arith.addf %258, %260 : vector<1x128xf32>
    %262 = arith.subf %185, %256 : vector<1x128xf32>
    %263 = math.exp %262 : vector<1x128xf32>
    %264 = arith.addf %261, %263 : vector<1x128xf32>
    %265 = arith.subf %207, %256 : vector<1x128xf32>
    %266 = math.exp %265 : vector<1x128xf32>
    %267 = arith.addf %264, %266 : vector<1x128xf32>
    %268 = arith.subf %229, %256 : vector<1x128xf32>
    %269 = math.exp %268 : vector<1x128xf32>
    %270 = arith.addf %267, %269 : vector<1x128xf32>
    %271 = arith.subf %251, %256 : vector<1x128xf32>
    %272 = math.exp %271 : vector<1x128xf32>
    %273 = arith.addf %270, %272 : vector<1x128xf32>
    %274 = math.log %273 : vector<1x128xf32>
    %275 = arith.addf %256, %274 : vector<1x128xf32>
    %276 = arith.addf %119, %275 : vector<1x128xf32>
    %cst_101 = arith.constant 0.000000e+00 : f32
    %277 = vector.broadcast %cst_101 : f32 to vector<1x128xf32>
    %278 = arith.maximumf %276, %277 : vector<1x128xf32>
    %279 = math.absf %276 : vector<1x128xf32>
    %cst_102 = arith.constant 0.000000e+00 : f32
    %280 = vector.broadcast %cst_102 : f32 to vector<1x128xf32>
    %281 = arith.subf %280, %279 : vector<1x128xf32>
    %282 = math.exp %281 : vector<1x128xf32>
    %283 = math.log1p %282 : vector<1x128xf32>
    %284 = arith.addf %278, %283 : vector<1x128xf32>
    %c0_103 = arith.constant 0 : index
    %c0_104 = arith.constant 0 : index
    %285 = vector.load %arg6[%c0_103, %c0_104] : memref<1x128xf32, #tpu.memory_space<vmem>>, vector<1x128xf32>
    tpu.vector_store %arg6[%c0_103, %c0_104], %284 {strides = array<i32>} : memref<1x128xf32, #tpu.memory_space<vmem>>, vector<1x128xf32>,
    return
  }
  func.func @transform_0(%arg0: i32) -> (i32, i32) {
    %c0_i32 = arith.constant 0 : i32
    %c0_i32_0 = arith.constant 0 : i32
    %c0_i32_1 = arith.constant 0 : i32
    return %c0_i32, %c0_i32_0 : i32, i32
  }
  func.func @transform_1(%arg0: i32) -> (i32, i32) {
    %c0_i32 = arith.constant 0 : i32
    %c0_i32_0 = arith.constant 0 : i32
    return %c0_i32, %arg0 : i32, i32
  }
  func.func @transform_2(%arg0: i32) -> (i32, i32, i32) {
    %c0_i32 = arith.constant 0 : i32
    %c0_i32_0 = arith.constant 0 : i32
    %c0_i32_1 = arith.constant 0 : i32
    return %c0_i32, %c0_i32_0, %arg0 : i32, i32, i32
  }
  func.func @transform_3(%arg0: i32) -> (i32, i32, i32) {
    %c0_i32 = arith.constant 0 : i32
    %c0_i32_0 = arith.constant 0 : i32
    %c0_i32_1 = arith.constant 0 : i32
    return %c0_i32, %c0_i32_0, %arg0 : i32, i32, i32
  }
  func.func @transform_4(%arg0: i32) -> (i32, i32) {
    %c0_i32 = arith.constant 0 : i32
    %c0_i32_0 = arith.constant 0 : i32
    return %c0_i32, %arg0 : i32, i32
  }
  func.func @transform_5(%arg0: i32) -> (i32, i32) {
    %c0_i32 = arith.constant 0 : i32
    %c0_i32_0 = arith.constant 0 : i32
    return %c0_i32, %arg0 : i32, i32
  }
}

</mosaic_0001>

<bundles_post_ra>
// kernel: tpu_custom_call.1
= control target key start
LH: loop header
LB: loop body
LE: loop exit
PB: predicated region body
PF: predicated region fallthrough
CT: control target
= control target key end

     0   :  { %11 = vsyncpa [#allocation4], 0  ;;  %s1294_s0 = inlined_call_operand.<no memory space> [shape: f32[1,1], index: 0, kind: input, shape index: {}]   ;;  %s1295_s1 = inlined_call_operand.hbm [shape: f32[32,128], index: 1, kind: input, shape index: {}]   ;;  %s1296_s2 = inlined_call_operand.hbm [shape: f32[4,32,128], index: 2, kind: input, shape index: {}]   ;;  %s1297_s3 = inlined_call_operand.hbm [shape: f32[6,32,128], index: 3, kind: input, shape index: {}]   ;;  %s1298_s4 = inlined_call_operand.vmem [shape: f32[4,128], index: 4, kind: input, shape index: {}]   ;;  %s1299_s5 = inlined_call_operand.hbm [shape: f32[1,128], index: 5, kind: output, shape index: {}]  }
   0x1   :  { %12 = vsyncpa [#allocation7], 0 }
   0x2   :  { %13 = vsyncpa [#allocation5], 0  ;;  %s33_s20 = sshll.u32 %s1296_s2, 4  ;;  %s850_s21 = smov [#allocation6]   ;;  %s34_s20 = int_to_ptr.hbm [resolvable:$true] %s33_s20 }
   0x3   :  { %s35_s22 = sshll.u32 %s850_s21, 4  ;;  %s20_s25 = sshll.u32 %s1295_s1, 4  ;;  %s36_s22 = int_to_ptr.vmem [resolvable:$true] %s35_s22  ;;  %s21_s25 = int_to_ptr.hbm [resolvable:$true] %s20_s25 }
   0x4   :  { %s851_s26 = smov 128   ;;  %s852_s27 = smov 8  }
   0x5   :  { %41 = dma.hbm_to_vmem [thread:$0]  %s34_s20, 2048, %s36_s22, [#allocation7], %s851_s26, %s851_s26, %s852_s27  }
   0x6   :  { %s853_s28 = smov [#allocation3]   ;;  %s46_s7 = sshll.u32 %s1297_s3, 4  ;;  %s47_s7 = int_to_ptr.hbm [resolvable:$true] %s46_s7 }
   0x7   :  { %s22_s29 = sshll.u32 %s853_s28, 4  ;;  %s854_s2 = smov [#allocation8]   ;;  %s23_s29 = int_to_ptr.vmem [resolvable:$true] %s22_s29 }
   0x8   :  { %28 = dma.hbm_to_vmem [thread:$0]  %s21_s25, 512, %s23_s29, [#allocation4], %s851_s26, %s851_s26, %s852_s27  }
   0x9   :  { %s48_s8 = sshll.u32 %s854_s2, 4  ;;  %s49_s8 = int_to_ptr.vmem [resolvable:$true] %s48_s8 }
   0xa   :  { %54 = dma.hbm_to_vmem [thread:$0]  %s47_s7, 3072, %s49_s8, [#allocation7], %s851_s26, %s851_s26, %s852_s27  }
   0xb   :  { %844 = dma.done.wait [#allocation4], 512  }
   0xc   :  { %845 = vsyncadd [#allocation4], 4294966784 }
   0xd   :  { %846 = dma.done.wait [#allocation7], 5120  }
   0xe   :  { %847 = vsyncadd [#allocation7], 4294962176  ;;  %v895_v0 = vld [vmem:[#allocation3] sm:$0xff]  ;;  %v897_v1 = vld [vmem:[#allocation3 + $0x8] sm:$0xff]  ;;  %s671_s19 = sshll.u32 %s1299_s5, 4  ;;  %s672_s19 = int_to_ptr.hbm [resolvable:$true] %s671_s19 }
   0xf   :  { %v899_v2 = vld [vmem:[#allocation3 + $0x10] sm:$0xff]  ;;  %v901_v3 = vld [vmem:[#allocation3 + $0x18] sm:$0xff]  ;;  %v73_v4 = vmul.f32 %v895_v0, %v895_v0  ;;  %v74_v5 = vmul.f32 %v897_v1, %v897_v1  ;;  %v98_v7 = vld [vmem:[#allocation6] sm:$0xff] }
  0x10   :  { %v75_v6 = vmul.f32 %v899_v2, %v899_v2  ;;  %v99_v8 = vld [vmem:[#allocation6 + $0x8] sm:$0xff]  ;;  %v100_v9 = vld [vmem:[#allocation6 + $0x10] sm:$0xff]  ;;  %v101_v10 = vld [vmem:[#allocation6 + $0x18] sm:$0xff]  ;;  %v115_v11 = vmul.f32 %v98_v7, %v98_v7  ;;  %v76_v12 = vmul.f32 %v901_v3, %v901_v3  ;;  %v102_v51 = vmul.f32 %v98_v7, %v895_v0 }
  0x11   :  { %v77_v13 = vadd.f32 %v74_v5, %v73_v4  ;;  %v116_v14 = vmul.f32 %v99_v8, %v99_v8  ;;  %v149_v15 = vld [vmem:[#allocation6 + $0x20] sm:$0xff]  ;;  %v150_v16 = vld [vmem:[#allocation6 + $0x28] sm:$0xff]  ;;  %v117_v17 = vmul.f32 %v100_v9, %v100_v9  ;;  %v911_v18 = vld [vmem:[#allocation6 + $0x30] sm:$0xff]  ;;  %v118_v20 = vmul.f32 %v101_v10, %v101_v10 }
  0x12   :  { %v913_v22 = vld [vmem:[#allocation6 + $0x38] sm:$0xff]  ;;  %v166_v23 = vmul.f32 %v149_v15, %v149_v15  ;;  %v167_v24 = vmul.f32 %v150_v16, %v150_v16  ;;  %v168_v27 = vmul.f32 %v911_v18, %v911_v18  ;;  %v200_v31 = vld [vmem:[#allocation6 + $0x40] sm:$0xff]  ;;  %v201_v32 = vld [vmem:[#allocation6 + $0x48] sm:$0xff]  ;;  %v103_v52 = vmul.f32 %v99_v8, %v897_v1 }
  0x13   :  { %v78_v19 = vadd.f32 %v77_v13, %v75_v6  ;;  %v119_v21 = vadd.f32 %v116_v14, %v115_v11  ;;  %v169_v28 = vmul.f32 %v913_v22, %v913_v22  ;;  %v919_v36 = vld [vmem:[#allocation6 + $0x50] sm:$0xff]  ;;  %v217_v38 = vmul.f32 %v200_v31, %v200_v31  ;;  %v921_v42 = vld [vmem:[#allocation6 + $0x58] sm:$0xff]  ;;  %v251_v56 = vld [vmem:[#allocation6 + $0x60] sm:$0xff] }
  0x14   :  { %v170_v29 = vadd.f32 %v167_v24, %v166_v23  ;;  %v218_v39 = vmul.f32 %v201_v32, %v201_v32  ;;  %v219_v43 = vmul.f32 %v919_v36, %v919_v36  ;;  %v220_v47 = vmul.f32 %v921_v42, %v921_v42  ;;  %v252_v57 = vld [vmem:[#allocation6 + $0x68] sm:$0xff]  ;;  %v253_v61 = vld [vmem:[#allocation6 + $0x70] sm:$0xff]  ;;  %v254_v11 = vld [vmem:[#allocation6 + $0x78] sm:$0xff] }
  0x15   :  { %v79_v25 = vadd.f32 %v78_v19, %v76_v12  ;;  %v120_v26 = vadd.f32 %v119_v21, %v117_v17  ;;  %v104_v59 = vmul.f32 %v100_v9, %v899_v2  ;;  %v106_v60 = vadd.f32 %v103_v52, %v102_v51 }
  0x16   :  { %v171_v33 = vadd.f32 %v170_v29, %v168_v27  ;;  %v221_v45 = vadd.f32 %v218_v39, %v217_v38  ;;  %v268_v4 = vmul.f32 %v251_v56, %v251_v56  ;;  %v269_v5 = vmul.f32 %v252_v57, %v252_v57  ;;  %v322_v27 = vld [vmem:[#allocation8] sm:$0xff] }
  0x17   :  { %v121_v30 = vadd.f32 %v120_v26, %v118_v20  ;;  %v80_v34 = vrot.slane %v79_v25, 4  ;;  %v270_v7 = vmul.f32 %v253_v61, %v253_v61  ;;  %v105_v8 = vmul.f32 %v101_v10, %v901_v3 }
  0x18   :  { %v172_v37 = vadd.f32 %v171_v33, %v169_v28  ;;  %v222_v49 = vadd.f32 %v221_v45, %v219_v43  ;;  %v272_v13 = vadd.f32 %v269_v5, %v268_v4  ;;  %v107_v14 = vadd.f32 %v106_v60, %v104_v59  ;;  %v323_v28 = vld [vmem:[#allocation8 + $0x8] sm:$0xff]  ;;  %v947_v45 = vld [vmem:[#allocation8 + $0x18] sm:$0xff] }
  0x19   :  { %v122_v35 = vrot.slane %v121_v30, 4  ;;  %v81_v44 = vadd.f32 %v80_v34, %v79_v25  ;;  %v153_v17 = vmul.f32 %v149_v15, %v895_v0  ;;  %v154_v19 = vmul.f32 %v150_v16, %v897_v1 }
  0x1a   :  { %v173_v41 = vrot.slane %v172_v37, 4  ;;  %v223_v54 = vadd.f32 %v222_v49, %v220_v47  ;;  %v271_v21 = vmul.f32 %v254_v11, %v254_v11  ;;  %v273_v23 = vadd.f32 %v272_v13, %v270_v7  ;;  %v964_v7 = vld [vmem:[#allocation8 + $0x20] sm:$0xff] }
  0x1b   :  { %v123_v40 = vadd.f32 %v122_v35, %v121_v30  ;;  %v82_v50 = vrot.slane %v81_v44, 2  ;;  %v155_v26 = vmul.f32 %v911_v18, %v899_v2  ;;  %v108_v29 = vadd.f32 %v107_v14, %v105_v8 }
  0x1c   :  { %v174_v48 = vadd.f32 %v173_v41, %v172_v37  ;;  %v224_v63 = vrot.slane %v223_v54, 4  ;;  %v157_v30 = vadd.f32 %v154_v19, %v153_v17  ;;  %v204_v10 = vmul.f32 %v200_v31, %v895_v0  ;;  %v324_v37 = vld [vmem:[#allocation8 + $0x10] sm:$0xff] }
  0x1d   :  { %v124_v46 = vrot.slane %v123_v40, 2  ;;  %v83_v58 = vadd.f32 %v82_v50, %v81_v44  ;;  %v205_v33 = vmul.f32 %v201_v32, %v897_v1  ;;  %v255_v34 = vmul.f32 %v251_v56, %v895_v0 }
  0x1e   :  { %v175_v55 = vrot.slane %v174_v48, 2  ;;  %v225_v9 = vadd.f32 %v224_v63, %v223_v54  ;;  %v274_v35 = vadd.f32 %v273_v23, %v271_v21  ;;  %v256_v39 = vmul.f32 %v252_v57, %v897_v1 }
  0x1f   :  { %v125_v53 = vadd.f32 %v124_v46, %v123_v40  ;;  %v84_v12 = vrot.slane %v83_v58, 1  ;;  %v339_v40 = vmul.f32 %v322_v27, %v322_v27  ;;  %v340_v18 = vmul.f32 %v323_v28, %v323_v28 }
  0x20   :  { %v176_v6 = vadd.f32 %v175_v55, %v174_v48  ;;  %v226_v16 = vrot.slane %v225_v9, 2  ;;  %v156_v43 = vmul.f32 %v913_v22, %v901_v3  ;;  %v109_v31 = vrot.slane %v108_v29, 4 }
  0x21   :  { %v126_v62 = vrot.slane %v125_v53, 1  ;;  %v85_v25 = vadd.f32 %v84_v12, %v83_v58  ;;  %v158_v44 = vadd.f32 %v157_v30, %v155_v26  ;;  %v206_v32 = vmul.f32 %v919_v36, %v899_v2  ;;  %v978_v30 = vld [vmem:[#allocation8 + $0x30] sm:$0xff] }
  0x22   :  { %v177_v24 = vrot.slane %v176_v6, 1  ;;  %v341_v46 = vmul.f32 %v324_v37, %v324_v37  ;;  %v208_v47 = vadd.f32 %v205_v33, %v204_v10  ;;  %v227_v48 = vadd.f32 %v226_v16, %v225_v9 }
  0x23   :  { %v127_v20 = vadd.f32 %v126_v62, %v125_v53  ;;  %v941_v41 = vmax.f32 %v85_v25, 1e-24  ;;  %v275_v49 = vrot.slane %v274_v35, 4  ;;  %v257_v51 = vmul.f32 %v253_v61, %v899_v2 }
  0x24   :  { %v178_v38 = vadd.f32 %v177_v24, %v176_v6  ;;  %v259_v52 = vadd.f32 %v256_v39, %v255_v34  ;;  %v343_v53 = vadd.f32 %v340_v18, %v339_v40  ;;  %v342_v22 = vmul.f32 %v947_v45, %v947_v45 }
  0x25   :  { %v937_v15 = vmax.f32 %v127_v20, 1e-24  ;;  %v207_v36 = vmul.f32 %v921_v42, %v901_v3  ;;  %v159_v55 = vadd.f32 %v158_v44, %v156_v43  ;;  %v209_v56 = vadd.f32 %v208_v47, %v206_v32  ;;  %v373_v20 = vld [vmem:[#allocation8 + $0x28] sm:$0xff] }
  0x26   :  { %v950_v50 = vmax.f32 %v178_v38, 1e-24  ;;  %v344_v54 = vadd.f32 %v343_v53, %v341_v46  ;;  %v228_v57 = vrot.slane %v227_v48, 1  ;;  %v276_v58 = vadd.f32 %v275_v49, %v274_v35 }
  0x27   :  { %698 = vrsqrt.f32 %v937_v15  ;;  %v110_v59 = vadd.f32 %v109_v31, %v108_v29  ;;  %v258_v60 = vmul.f32 %v254_v11, %v901_v3  ;;  %v260_v61 = vadd.f32 %v259_v52, %v257_v51 }
  0x28   :  { %700 = vrsqrt.f32 %v941_v41  ;;  %v345_v63 = vadd.f32 %v344_v54, %v342_v22  ;;  %v160_v5 = vrot.slane %v159_v55, 4  ;;  %v210_v6 = vadd.f32 %v209_v56, %v207_v36 }
  0x29   :  { %702 = vrsqrt.f32 %v950_v50  ;;  %v229_v12 = vadd.f32 %v228_v57, %v227_v48  ;;  %v277_v42 = vrot.slane %v276_v58, 2  ;;  %v111_v13 = vrot.slane %v110_v59, 2 }
  0x2a   :  { %v261_v14 = vadd.f32 %v260_v61, %v258_v60  ;;  %v326_v17 = vmul.f32 %v322_v27, %v895_v0  ;;  %v327_v11 = vmul.f32 %v323_v28, %v897_v1  ;;  %v346_v19 = vrot.slane %v345_v63, 4  ;;  %v980_v27 = vld [vmem:[#allocation8 + $0x38] sm:$0xff] }
  0x2b   :  { %v389_v23 = vmul.f32 %v964_v7, %v964_v7  ;;  %v161_v24 = vadd.f32 %v160_v5, %v159_v55  ;;  %v211_v25 = vrot.slane %v210_v6, 4  ;;  %v976_v26 = vmax.f32 %v229_v12, 1e-24  ;;  %v1007_v5 = vld [vmem:[#allocation8 + $0x48] sm:$0xff] }
  0x2c   :  { %v278_v29 = vadd.f32 %v277_v42, %v276_v58  ;;  %v982_v28 = vadd.f32 %v111_v13, %v110_v59  ;;  %v262_v33 = vrot.slane %v261_v14, 4  ;;  %v390_v16 = vmul.f32 %v373_v20, %v373_v20  ;;  %v1010_v13 = vld [vmem:[#allocation8 + $0x50] sm:$0xff] }
  0x2d   :  { %v960_v62 = vpop.eup %698  ;;  %v328_v35 = vmul.f32 %v324_v37, %v899_v2  ;;  %v330_v38 = vadd.f32 %v327_v11, %v326_v17  ;;  %v347_v39 = vadd.f32 %v346_v19, %v345_v63  ;;  %v391_v18 = vmul.f32 %v978_v30, %v978_v30  ;;  %v1005_v63 = vld [vmem:[#allocation8 + $0x40] sm:$0xff] }
  0x2e   :  { %v962_v4 = vpop.eup %700  ;;  %v130_v8 = vmul.f32 %v960_v62, %v937_v15  ;;  %v392_v43 = vmul.f32 %v980_v27, %v980_v27  ;;  %v393_v31 = vadd.f32 %v390_v16, %v389_v23  ;;  %v162_v44 = vrot.slane %v161_v24, 2  ;;  %v1020_v23 = vld [vmem:[#allocation8 + $0x58] sm:$0xff] }
  0x2f   :  { %v970_v9 = vpop.eup %702  ;;  %v88_v21 = vmul.f32 %v962_v4, %v941_v41  ;;  %v212_v32 = vadd.f32 %v211_v25, %v210_v6  ;;  %704 = vrsqrt.f32 %v976_v26  ;;  %v279_v46 = vrot.slane %v278_v29, 1 }
  0x30   :  { %v131_v10 = vmul.f32 %v960_v62, %v130_v8  ;;  %v181_v34 = vmul.f32 %v970_v9, %v950_v50  ;;  %v394_v48 = vadd.f32 %v393_v31, %v391_v18  ;;  %v113_v37 = vrot.slane %v982_v28, 1 }
  0x31   :  { %v89_v40 = vmul.f32 %v962_v4, %v88_v21  ;;  %v329_v51 = vmul.f32 %v947_v45, %v901_v3  ;;  %v348_v52 = vrot.slane %v347_v39, 2  ;;  %v263_v22 = vadd.f32 %v262_v33, %v261_v14 }
  0x32   :  { %v132_v47 = vmul.f32 0.5, %v131_v10  ;;  %v182_v49 = vmul.f32 %v970_v9, %v181_v34  ;;  %v331_v36 = vadd.f32 %v330_v38, %v328_v35  ;;  %v395_v54 = vadd.f32 %v394_v48, %v392_v43 }
  0x33   :  { %v90_v53 = vmul.f32 0.5, %v89_v40  ;;  %vm93_vm0 = vweird.f32 %v941_v41  ;;  %v163_v55 = vadd.f32 %v162_v44, %v161_v24  ;;  %v213_v56 = vrot.slane %v212_v32, 2 }
  0x34   :  { %v280_v57 = vadd.f32 %v279_v46, %v278_v29  ;;  %vm94_vm1 = vweird.f32 %v962_v4  ;;  %v133_v58 = vsub.f32 1.5, %v132_v47  ;;  %vm135_vm2 = vweird.f32 %v937_v15 }
  0x35   :  { %vm186_vm3 = vweird.f32 %v950_v50  ;;  %v1002_v59 = vpop.eup %704  ;;  %vm136_vm4 = vweird.f32 %v960_v62  ;;  %v183_v45 = vmul.f32 0.5, %v182_v49  ;;  %v349_v60 = vadd.f32 %v348_v52, %v347_v39  ;;  %vm95_vm7 = vmor %vm93_vm0, %vm94_vm1  ;;  %v470_v52 = vld [vmem:[#allocation8 + $0x60] sm:$0xff]  ;;  %v1066_v50 = vld [vmem:[#allocation8 + $0x70] sm:$0xff] }
  0x36   :  { %v396_v61 = vrot.slane %v395_v54, 4  ;;  %v91_v6 = vsub.f32 1.5, %v90_v53  ;;  %vm187_vm5 = vweird.f32 %v970_v9  ;;  %v264_v12 = vrot.slane %v263_v22, 2  ;;  %vm1030_vm6 = vmor %vm135_vm2, %vm136_vm4 }
  0x37   :  { %v332_v42 = vadd.f32 %v331_v36, %v329_v51  ;;  %v1012_v8 = vmax.f32 %v280_v57, 1e-24  ;;  %v376_v14 = vmul.f32 %v964_v7, %v895_v0  ;;  %v377_v17 = vmul.f32 %v373_v20, %v897_v1  ;;  %vm1059_vm8 = vmor %vm186_vm3, %vm187_vm5 }
  0x38   :  { %v397_v11 = vadd.f32 %v396_v61, %v395_v54  ;;  %v134_v19 = vmul.f32 %v960_v62, %v133_v58  ;;  %v232_v21 = vmul.f32 %v1002_v59, %v976_v26  ;;  %v438_v24 = vmul.f32 %v1005_v63, %v1005_v63 }
  0x39   :  { %v439_v25 = vmul.f32 %v1007_v5, %v1007_v5  ;;  %v184_v20 = vsub.f32 1.5, %v183_v45  ;;  %v350_v29 = vrot.slane %v349_v60, 1  ;;  %v440_v33 = vmul.f32 %v1010_v13, %v1010_v13 }
  0x3a   :  { %v398_v10 = vrot.slane %v397_v11, 2  ;;  %v92_v16 = vmul.f32 %v962_v4, %v91_v6  ;;  %v333_v34 = vrot.slane %v332_v42, 4  ;;  %v378_v35 = vmul.f32 %v978_v30, %v899_v2 }
  0x3b   :  { %v442_v38 = vadd.f32 %v439_v25, %v438_v24  ;;  %706 = vrsqrt.f32 %v1012_v8  ;;  %v380_v15 = vadd.f32 %v377_v17, %v376_v14  ;;  %v441_v40 = vmul.f32 %v1020_v23, %v1020_v23 }
  0x3c   :  { %v399_v39 = vadd.f32 %v398_v10, %v397_v11  ;;  %v138_v18 = vsel %vm1030_vm6, %v960_v62, %v134_v19  ;;  %v164_v43 = vrot.slane %v163_v55, 1  ;;  %v214_v31 = vadd.f32 %v213_v56, %v212_v32  ;;  %v471_v56 = vld [vmem:[#allocation8 + $0x68] sm:$0xff] }
  0x3d   :  { %v233_v30 = vmul.f32 %v1002_v59, %v232_v21  ;;  %v185_v44 = vmul.f32 %v970_v9, %v184_v20  ;;  %v351_v46 = vadd.f32 %v350_v29, %v349_v60  ;;  %v443_v47 = vadd.f32 %v442_v38, %v440_v33 }
  0x3e   :  { %v400_v41 = vrot.slane %v399_v39, 1  ;;  %v1052_v48 = vsel %vm95_vm7, %v962_v4, %v92_v16  ;;  %v114_v49 = vadd.f32 %v113_v37, %v982_v28  ;;  %v265_v32 = vadd.f32 %v264_v12, %v263_v22 }
  0x3f   :  { %v334_v51 = vadd.f32 %v333_v34, %v332_v42  ;;  %v379_v53 = vmul.f32 %v980_v27, %v901_v3  ;;  %v381_v36 = vadd.f32 %v380_v15, %v378_v35  ;;  %v444_v4 = vadd.f32 %v443_v47, %v441_v40  ;;  %v1076_v42 = vld [vmem:[#allocation8 + $0x78] sm:$0xff] }
  0x40   :  { %v401_v54 = vadd.f32 %v400_v41, %v399_v39  ;;  %v139_v28 = vmul.f32 %v138_v18, %v1052_v48  ;;  %v165_v37 = vadd.f32 %v164_v43, %v163_v55  ;;  %v215_v57 = vrot.slane %v214_v31, 1 }
  0x41   :  { %v234_v58 = vmul.f32 0.5, %v233_v30  ;;  %v1068_v45 = vpop.eup %706  ;;  %v189_v22 = vsel %vm1059_vm8, %v970_v9, %v185_v44  ;;  %v1073_v60 = vmax.f32 %v351_v46, 1e-24  ;;  %v445_v27 = vrot.slane %v444_v4, 4 }
  0x42   :  { %v487_v61 = vmul.f32 %v470_v52, %v470_v52  ;;  %vm237_vm9 = vweird.f32 %v976_v26  ;;  %v266_v6 = vrot.slane %v265_v32, 1  ;;  %v335_v12 = vrot.slane %v334_v51, 2 }
  0x43   :  { %v488_v55 = vmul.f32 %v471_v56, %v471_v56  ;;  %v382_v14 = vadd.f32 %v381_v36, %v379_v53  ;;  %v1078_v17 = vmax.f32 %v401_v54, 1e-24  ;;  %v446_v11 = vadd.f32 %v445_v27, %v444_v4 }
  0x44   :  { %v489_v19 = vmul.f32 %v1066_v50, %v1066_v50  ;;  %v140_v21 = vmul.f32 %v139_v28, %v114_v49  ;;  %v190_v9 = vmul.f32 %v189_v22, %v1052_v48  ;;  %v235_v24 = vsub.f32 1.5, %v234_v58 }
  0x45   :  { %v283_v25 = vmul.f32 %v1068_v45, %v1012_v8  ;;  %708 = vrsqrt.f32 %v1073_v60  ;;  %v447_v7 = vrot.slane %v446_v11, 2  ;;  %v490_v20 = vmul.f32 %v1076_v42, %v1076_v42 }
  0x46   :  { %v491_v29 = vadd.f32 %v488_v55, %v487_v61  ;;  %vm238_vm10 = vweird.f32 %v1002_v59  ;;  %v336_v10 = vadd.f32 %v335_v12, %v334_v51  ;;  %v425_v33 = vmul.f32 %v1005_v63, %v895_v0 }
  0x47   :  { %v426_v16 = vmul.f32 %v1007_v5, %v897_v1  ;;  %v383_v34 = vrot.slane %v382_v14, 4  ;;  %710 = vrsqrt.f32 %v1078_v17  ;;  %v448_v35 = vadd.f32 %v447_v7, %v446_v11  ;;  %vm1097_vm11 = vmor %vm237_vm9, %vm238_vm10 }
  0x48   :  { %v492_v38 = vadd.f32 %v491_v29, %v489_v19  ;;  %v191_v15 = vmul.f32 %v190_v9, %v165_v37  ;;  %v216_v39 = vadd.f32 %v215_v57, %v214_v31  ;;  %v236_v40 = vmul.f32 %v1002_v59, %v235_v24  ;;  %v520_v19 = vld [vmem:[#allocation8 + $0x88] sm:$0xff]  ;;  %v521_v24 = vld [vmem:[#allocation8 + $0x90] sm:$0xff]  ;;  %v522_v29 = vld [vmem:[#allocation8 + $0x98] sm:$0xff] }
  0x49   :  { %v142_v18 = vsub.f32 1.15, %v140_v21  ;;  %v284_v63 = vmul.f32 %v1068_v45, %v283_v25  ;;  %v449_v30 = vrot.slane %v448_v35, 1  ;;  %v1102_v44 = vadd.f32 -0.85, %v140_v21 }
  0x4a   :  { %v493_v5 = vadd.f32 %v492_v38, %v490_v20  ;;  %v1104_v46 = vadd.f32 %v266_v6, %v265_v32  ;;  %v427_v31 = vmul.f32 %v1010_v13, %v899_v2  ;;  %v429_v41 = vadd.f32 %v426_v16, %v425_v33  ;;  %v519_v6 = vld [vmem:[#allocation8 + $0x80] sm:$0xff] }
  0x4b   :  { %v1108_v47 = vpop.eup %708  ;;  %v337_v49 = vrot.slane %v336_v10, 1  ;;  %v384_v26 = vadd.f32 %v383_v34, %v382_v14  ;;  %v450_v62 = vadd.f32 %v449_v30, %v448_v35  ;;  %v193_v53 = vsub.f32 1.15, %v191_v15 }
  0x4c   :  { %v494_v51 = vrot.slane %v493_v5, 4  ;;  %v240_v36 = vsel %vm1097_vm11, %v1002_v59, %v236_v40  ;;  %vm288_vm12 = vweird.f32 %v1012_v8  ;;  %v474_v32 = vmul.f32 %v470_v52, %v895_v0 }
  0x4d   :  { %v475_v54 = vmul.f32 %v471_v56, %v897_v1  ;;  %v1116_v4 = vpop.eup %710  ;;  %v1118_v13 = vmax.f32 %v142_v18, 0.0  ;;  %v1120_v28 = vadd.f32 -0.85, %v191_v15  ;;  %v285_v37 = vmul.f32 0.5, %v284_v63 }
  0x4e   :  { %v1122_v57 = vmax.f32 %v450_v62, 1e-24  ;;  %v354_v58 = vmul.f32 %v1108_v47, %v1073_v60  ;;  %v428_v59 = vmul.f32 %v1020_v23, %v901_v3  ;;  %v430_v22 = vadd.f32 %v429_v41, %v427_v31 }
  0x4f   :  { %v495_v27 = vadd.f32 %v494_v51, %v493_v5  ;;  %v241_v52 = vmul.f32 %v240_v36, %v1052_v48  ;;  %v1129_v56 = vadd.f32 %v337_v49, %v336_v10  ;;  %v385_v61 = vrot.slane %v384_v26, 2 }
  0x50   :  { %712 = vrsqrt.f32 %v1122_v57  ;;  %v404_v12 = vmul.f32 %v1116_v4, %v1078_v17  ;;  %v476_v55 = vmul.f32 %v1066_v50, %v899_v2  ;;  %v478_v14 = vadd.f32 %v475_v54, %v474_v32 }
  0x51   :  { %v496_v11 = vrot.slane %v495_v27, 2  ;;  %v144_v23 = vsub.f32 0.0, %v1118_v13  ;;  %v1137_v21 = vmax.f32 %v193_v53, 0.0  ;;  %v286_v9 = vsub.f32 1.5, %v285_v37  ;;  %v568_v37 = vld [vmem:[#allocation8 + $0xa0] sm:$0xff] }
  0x52   :  { %vm289_vm13 = vweird.f32 %v1068_v45  ;;  %v355_v25 = vmul.f32 %v1108_v47, %v354_v58  ;;  %v431_v7 = vadd.f32 %v430_v22, %v428_v59  ;;  %v536_v10 = vmul.f32 %v519_v6, %v519_v6 }
  0x53   :  { %v497_v20 = vadd.f32 %v496_v11, %v495_v27  ;;  %v1141_v33 = vmul.f32 %v241_v52, %v216_v39  ;;  %v386_v50 = vadd.f32 %v385_v61, %v384_v26  ;;  %v477_v16 = vmul.f32 %v1076_v42, %v901_v3  ;;  %vm1157_vm14 = vmor %vm288_vm12, %vm289_vm13 }
  0x54   :  { %v537_v34 = vmul.f32 %v520_v19, %v520_v19  ;;  %v405_v35 = vmul.f32 %v1116_v4, %v404_v12  ;;  %v479_v38 = vadd.f32 %v478_v14, %v476_v55  ;;  %v538_v40 = vmul.f32 %v521_v24, %v521_v24  ;;  %v570_v12 = vld [vmem:[#allocation8 + $0xb0] sm:$0xff] }
  0x55   :  { %v498_v15 = vrot.slane %v497_v20, 1  ;;  %v523_v43 = vmul.f32 %v519_v6, %v895_v0  ;;  %v524_v63 = vmul.f32 %v520_v19, %v897_v1  ;;  %v539_v30 = vmul.f32 %v522_v29, %v522_v29  ;;  %v569_v6 = vld [vmem:[#allocation8 + $0xa8] sm:$0xff] }
  0x56   :  { %v1146_v18 = vpop.eup %712  ;;  %v540_v5 = vadd.f32 %v537_v34, %v536_v10  ;;  %v287_v39 = vmul.f32 %v1068_v45, %v286_v9  ;;  %v356_v31 = vmul.f32 0.5, %v355_v25  ;;  %v432_v41 = vrot.slane %v431_v7, 4  ;;  %v571_v25 = vld [vmem:[#allocation8 + $0xb8] sm:$0xff] }
  0x57   :  { %v499_v49 = vadd.f32 %v498_v15, %v497_v20  ;;  %v195_v42 = vsub.f32 0.0, %v1137_v21  ;;  %v244_v26 = vsub.f32 1.15, %v1141_v33  ;;  %v453_v51 = vmul.f32 %v1146_v18, %v1122_v57 }
  0x58   :  { %v541_v53 = vadd.f32 %v540_v5, %v538_v40  ;;  %vm359_vm15 = vweird.f32 %v1073_v60  ;;  %v406_v36 = vmul.f32 0.5, %v405_v35  ;;  %v480_v32 = vadd.f32 %v479_v38, %v477_v16 }
  0x59   :  { %v1164_v54 = vmax.f32 %v499_v49, 1e-24  ;;  %v387_v58 = vrot.slane %v386_v50, 1  ;;  %v525_v59 = vmul.f32 %v521_v24, %v899_v2  ;;  %v527_v22 = vadd.f32 %v524_v63, %v523_v43 }
  0x5a   :  { %v542_v8 = vadd.f32 %v541_v53, %v539_v30  ;;  %v291_v27 = vsel %vm1157_vm14, %v1068_v45, %v287_v39  ;;  %v357_v52 = vsub.f32 1.5, %v356_v31  ;;  %vm360_vm0 = vweird.f32 %v1108_v47 }
  0x5b   :  { %v433_v61 = vadd.f32 %v432_v41, %v431_v7  ;;  %v454_v55 = vmul.f32 %v1146_v18, %v453_v51  ;;  %714 = vrsqrt.f32 %v1164_v54  ;;  %v585_v11 = vmul.f32 %v568_v37, %v568_v37  ;;  %vm1183_vm3 = vmor %vm359_vm15, %vm360_vm0 }
  0x5c   :  { %v543_v14 = vrot.slane %v542_v8, 4  ;;  %v407_v19 = vsub.f32 1.5, %v406_v36  ;;  %vm409_vm1 = vweird.f32 %v1078_v17  ;;  %v481_v9 = vrot.slane %v480_v32, 4 }
  0x5d   :  { %v526_v24 = vmul.f32 %v522_v29, %v901_v3  ;;  %v528_v45 = vadd.f32 %v527_v22, %v525_v59  ;;  %v586_v10 = vmul.f32 %v569_v6, %v569_v6  ;;  %v587_v16 = vmul.f32 %v570_v12, %v570_v12 }
  0x5e   :  { %v544_v20 = vadd.f32 %v543_v14, %v542_v8  ;;  %v358_v7 = vmul.f32 %v1108_v47, %v357_v52  ;;  %vm410_vm2 = vweird.f32 %v1116_v4  ;;  %v572_v34 = vmul.f32 %v568_v37, %v895_v0 }
  0x5f   :  { %v573_v35 = vmul.f32 %v569_v6, %v897_v1  ;;  %v455_v29 = vmul.f32 0.5, %v454_v55  ;;  %v588_v40 = vmul.f32 %v571_v25, %v571_v25  ;;  %v589_v43 = vadd.f32 %v586_v10, %v585_v11  ;;  %vm1200_vm4 = vmor %vm409_vm1, %vm410_vm2 }
  0x60   :  { %v545_v15 = vrot.slane %v544_v20, 2  ;;  %v1187_v63 = vmax.f32 %v244_v26, 0.0  ;;  %v292_v30 = vmul.f32 %v291_v27, %v1052_v48  ;;  %v388_v5 = vadd.f32 %v387_v58, %v386_v50 }
  0x61   :  { %v482_v0 = vadd.f32 %v481_v9, %v480_v32  ;;  %v1190_v39 = vpop.eup %714  ;;  %v408_v1 = vmul.f32 %v1116_v4, %v407_v19  ;;  %v529_v31 = vadd.f32 %v528_v45, %v526_v24  ;;  %v590_v41 = vadd.f32 %v589_v43, %v587_v16 }
  0x62   :  { %v546_v60 = vadd.f32 %v545_v15, %v544_v20  ;;  %v362_v49 = vsel %vm1183_vm3, %v1108_v47, %v358_v7  ;;  %v434_v50 = vrot.slane %v433_v61, 2  ;;  %v502_v62 = vmul.f32 %v1190_v39, %v1164_v54  ;;  %v141_v7 = vld [vmem:[%s1298_s4] sm:$0x1] }
  0x63   :  { %v574_v51 = vmul.f32 %v570_v12, %v899_v2  ;;  %v456_v53 = vsub.f32 1.5, %v455_v29  ;;  %v576_v32 = vadd.f32 %v573_v35, %v572_v34  ;;  %v591_v37 = vadd.f32 %v590_v41, %v588_v40  ;;  %v192_v35 = vld [vmem:[%s1298_s4 + $0x1] sm:$0x1] }
  0x64   :  { %v547_v36 = vrot.slane %v546_v60, 1  ;;  %v1208_v47 = vmul.f32 %v292_v30, %v1104_v46  ;;  %vm458_vm5 = vweird.f32 %v1122_v57  ;;  %v483_v17 = vrot.slane %v482_v0, 2 }
  0x65   :  { %v503_v58 = vmul.f32 %v1190_v39, %v502_v62  ;;  %v412_v59 = vsel %vm1200_vm4, %v1116_v4, %v408_v1  ;;  %vm459_vm6 = vweird.f32 %v1146_v18  ;;  %v530_v22 = vrot.slane %v529_v31, 4 }
  0x66   :  { %v548_v2 = vadd.f32 %v547_v36, %v546_v60  ;;  %v363_v8 = vmul.f32 %v362_v49, %v1052_v48  ;;  %v435_v27 = vadd.f32 %v434_v50, %v433_v61  ;;  %v592_v6 = vrot.slane %v591_v37, 4  ;;  %vm1224_vm7 = vmor %vm458_vm5, %vm459_vm6 }
  0x67   :  { %v504_v52 = vmul.f32 0.5, %v503_v58  ;;  %v457_v46 = vmul.f32 %v1146_v18, %v456_v53  ;;  %v575_v55 = vmul.f32 %v571_v25, %v901_v3  ;;  %v577_v14 = vadd.f32 %v576_v32, %v574_v51 }
  0x68   :  { %v1218_v12 = vmax.f32 %v548_v2, 1e-24  ;;  %v413_v11 = vmul.f32 %v412_v59, %v1052_v48  ;;  %v484_v19 = vadd.f32 %v483_v17, %v482_v0  ;;  %v593_v61 = vadd.f32 %v592_v6, %v591_v37  ;;  %v243_v37 = vld [vmem:[%s1298_s4 + $0x2] sm:$0x1] }
  0x69   :  { %v505_v9 = vsub.f32 1.5, %v504_v52  ;;  %vm507_vm8 = vweird.f32 %v1164_v54  ;;  %vm508_vm9 = vweird.f32 %v1190_v39  ;;  %v531_v24 = vadd.f32 %v530_v22, %v529_v31 }
  0x6a   :  { %716 = vrsqrt.f32 %v1218_v12  ;;  %v146_v3 = vmul.f32 %v1102_v44, %v144_v23  ;;  %v436_v25 = vrot.slane %v435_v27, 1  ;;  %v594_v57 = vrot.slane %v593_v61, 2  ;;  %vm1249_vm10 = vmor %vm507_vm8, %vm508_vm9 }
  0x6b   :  { %v295_v45 = vsub.f32 1.15, %v1208_v47  ;;  %v461_v20 = vsel %vm1224_vm7, %v1146_v18, %v457_v46  ;;  %v506_v10 = vmul.f32 %v1190_v39, %v505_v9  ;;  %v578_v16 = vadd.f32 %v577_v14, %v575_v55 }
  0x6c   :  { %v197_v13 = vmul.f32 %v1120_v28, %v195_v42  ;;  %v246_v44 = vsub.f32 0.0, %v1187_v63  ;;  %v684_v23 = vadd.f32 -0.85, %v1141_v33  ;;  %v595_v18 = vadd.f32 %v594_v57, %v593_v61 }
  0x6d   :  { %v364_v38 = vmul.f32 %v363_v8, %v1129_v56  ;;  %v414_v21 = vmul.f32 %v413_v11, %v388_v5  ;;  %v485_v29 = vrot.slane %v484_v19, 1  ;;  %v532_v28 = vrot.slane %v531_v24, 2 }
  0x6e   :  { %v437_v42 = vadd.f32 %v436_v25, %v435_v27  ;;  %v462_v15 = vmul.f32 %v461_v20, %v1052_v48  ;;  %v596_v33 = vrot.slane %v595_v18, 1  ;;  %v1258_v54 = vmul.f32 %v146_v3, %v141_v7 }
  0x6f   :  { %v296_v43 = vmax.f32 %v295_v45, 0.0  ;;  %v510_v63 = vsel %vm1249_vm10, %v1190_v39, %v506_v10  ;;  %v579_v30 = vrot.slane %v578_v16, 4  ;;  %v1263_v0 = vmul.f32 %v197_v13, %v192_v35 }
  0x70   :  { %v717_v40 = vpop.eup %716  ;;  %v248_v1 = vmul.f32 %v684_v23, %v246_v44  ;;  %v597_v5 = vadd.f32 %v596_v33, %v595_v18  ;;  %v365_v31 = vadd.f32 0.15, %v364_v38  ;;  %v415_v60 = vadd.f32 0.15, %v414_v21 }
  0x71   :  { %v551_v56 = vmul.f32 %v717_v40, %v1218_v12  ;;  %v486_v41 = vadd.f32 %v485_v29, %v484_v19  ;;  %v533_v49 = vadd.f32 %v532_v28, %v531_v24  ;;  %v463_v26 = vmul.f32 %v462_v15, %v437_v42 }
  0x72   :  { %v511_v50 = vmul.f32 %v510_v63, %v1052_v48  ;;  %v598_v51 = vmax.f32 %v597_v5, 1e-24  ;;  %v297_v53 = vsub.f32 0.0, %v296_v43  ;;  %v685_v36 = vadd.f32 -0.85, %v1208_v47 }
  0x73   :  { %v552_v62 = vmul.f32 %v717_v40, %v551_v56  ;;  %v686_v39 = vadd.f32 -0.15, %v364_v38  ;;  %v580_v32 = vadd.f32 %v579_v30, %v578_v16  ;;  %vm556_vm11 = vweird.f32 %v1218_v12  ;;  %v294_v12 = vld [vmem:[%s1298_s4 + $0x3] sm:$0x1] }
  0x74   :  { %vm557_vm12 = vweird.f32 %v717_v40  ;;  %718 = vrsqrt.f32 %v598_v51  ;;  %v366_v58 = vmax.f32 %v365_v31, 0.0  ;;  %v416_v59 = vmax.f32 %v415_v60, 0.0 }
  0x75   :  { %v553_v17 = vmul.f32 0.5, %v552_v62  ;;  %v687_v22 = vadd.f32 -0.15, %v414_v21  ;;  %v534_v2 = vrot.slane %v533_v49, 1  ;;  %v464_v8 = vadd.f32 0.15, %v463_v26  ;;  %vm558_vm13 = vmor %vm556_vm11, %vm557_vm12 }
  0x76   :  { %v512_v27 = vmul.f32 %v511_v50, %v486_v41  ;;  %v301_v47 = vmax.f32 %v1258_v54, %v1263_v0  ;;  %v249_v6 = vmul.f32 %v248_v1, %v243_v37  ;;  %v299_v46 = vmul.f32 %v685_v36, %v297_v53 }
  0x77   :  { %v554_v52 = vsub.f32 1.5, %v553_v17  ;;  %v581_v14 = vrot.slane %v580_v32, 2  ;;  %v368_v11 = vmul.f32 %v686_v39, %v366_v58  ;;  %v369_v4 = vstv %s1294_s0  ;;  %s855_s0 = smov [#allocation9]  }
  0x78   :  { %v418_v19 = vmul.f32 %v687_v22, %v416_v59  ;;  %v535_v9 = vadd.f32 %v534_v2, %v533_v49  ;;  %v465_v24 = vmax.f32 %v464_v8, 0.0  ;;  %v688_v3 = vadd.f32 -0.15, %v463_v26  ;;  %s669_s4 = sshll.u32 %s855_s0, 4  ;;  %s670_s4 = int_to_ptr.vmem [resolvable:$true] %s669_s4 }
  0x79   :  { %v555_v55 = vmul.f32 %v717_v40, %v554_v52  ;;  %v513_v25 = vadd.f32 0.15, %v512_v27  ;;  %v300_v10 = vmul.f32 %v299_v46, %v294_v12  ;;  %v302_v16 = vmax.f32 %v301_v47, %v249_v6 }
  0x7a   :  { %v719_v61 = vpop.eup %718  ;;  %v582_v7 = vadd.f32 %v581_v14, %v580_v32  ;;  %v370_v13 = vmul.f32 %v369_v4, %v368_v11  ;;  %v419_v44 = vmul.f32 %v418_v19, %v369_v4  ;;  %v467_v18 = vmul.f32 %v688_v3, %v465_v24 }
  0x7b   :  { %v559_v57 = vsel %vm558_vm13, %v717_v40, %v555_v55  ;;  %v600_v20 = vmul.f32 %v719_v61, %v598_v51  ;;  %v514_v35 = vmax.f32 %v513_v25, 0.0  ;;  %v689_v38 = vadd.f32 -0.15, %v512_v27 }
  0x7c   :  { %v560_v45 = vmul.f32 %v559_v57, %v1052_v48  ;;  %vm605_vm14 = vweird.f32 %v598_v51  ;;  %vm606_vm15 = vweird.f32 %v719_v61  ;;  %v583_v28 = vrot.slane %v582_v7, 1 }
  0x7d   :  { %v601_v34 = vmul.f32 %v719_v61, %v600_v20  ;;  %v1281_v42 = vmax.f32 %v302_v16, %v300_v10  ;;  %v616_v33 = vmax.f32 %v370_v13, %v419_v44  ;;  %v468_v40 = vmul.f32 %v467_v18, %v369_v4  ;;  %vm607_vm0 = vmor %vm605_vm14, %vm606_vm15 }
  0x7e   :  { %v561_v23 = vmul.f32 %v560_v45, %v535_v9  ;;  %v516_v43 = vmul.f32 %v689_v38, %v514_v35  ;;  %v584_v56 = vadd.f32 %v583_v28, %v582_v7 }
  0x7f   :  { %v602_v29 = vmul.f32 0.5, %v601_v34  ;;  %v304_v5 = vsub.f32 %v1258_v54, %v1281_v42  ;;  %v617_v26 = vmax.f32 %v616_v33, %v468_v40  ;;  %v307_v50 = vsub.f32 %v1263_v0, %v1281_v42 }
  0x80   :  { %v562_v21 = vadd.f32 0.15, %v561_v23  ;;  %v690_v30 = vadd.f32 -0.15, %v561_v23  ;;  %v517_v60 = vmul.f32 %v516_v43, %v369_v4  ;;  %v311_v17 = vsub.f32 %v249_v6, %v1281_v42 }
  0x81   :  { %v603_v15 = vsub.f32 1.5, %v602_v29  ;;  %v305_v51 = vmul.f32 1.442695, %v304_v5  ;;  %v308_v37 = vmul.f32 1.442695, %v307_v50 }
  0x82   :  { %v563_v63 = vmax.f32 %v562_v21, 0.0  ;;  %v618_v32 = vmax.f32 %v617_v26, %v517_v60  ;;  %v312_v22 = vmul.f32 1.442695, %v311_v17 }
  0x83   :  { %v604_v1 = vmul.f32 %v719_v61, %v603_v15  ;;  %720 = vpow2.f32 %v305_v51 }
  0x84   :  { %v565_v41 = vmul.f32 %v690_v30, %v563_v63  ;;  %722 = vpow2.f32 %v308_v37 }
  0x85   :  { %v608_v31 = vsel %vm607_vm0, %v719_v61, %v604_v1  ;;  %724 = vpow2.f32 %v312_v22 }
  0x86   :  { %v609_v49 = vmul.f32 %v608_v31, %v1052_v48  ;;  %v566_v53 = vmul.f32 %v565_v41, %v369_v4  ;;  %v315_v48 = vsub.f32 %v300_v10, %v1281_v42 }
  0x88   :  { %v610_v62 = vmul.f32 %v609_v49, %v584_v56  ;;  %v619_v59 = vmax.f32 %v618_v32, %v566_v53  ;;  %v316_v0 = vmul.f32 1.442695, %v315_v48 }
  0x89   :  { %v721_v27 = vpop.eup %720 }
  0x8a   :  { %v611_v36 = vadd.f32 0.15, %v610_v62  ;;  %v691_v39 = vadd.f32 -0.15, %v610_v62  ;;  %v723_v14 = vpop.eup %722  ;;  %726 = vpow2.f32 %v316_v0 }
  0x8b   :  { %v310_v24 = vadd.f32 %v723_v14, %v721_v27  ;;  %v725_v3 = vpop.eup %724 }
  0x8c   :  { %v612_v58 = vmax.f32 %v611_v36, 0.0 }
  0x8d   :  { %v314_v57 = vadd.f32 %v725_v3, %v310_v24 }
  0x8e   :  { %v614_v54 = vmul.f32 %v691_v39, %v612_v58 }
  0x90   :  { %v615_v2 = vmul.f32 %v614_v54, %v369_v4  ;;  %v727_v45 = vpop.eup %726 }
  0x91   :  { %v318_v7 = vadd.f32 %v727_v45, %v314_v57 }
  0x92   :  { %v620_v8 = vmax.f32 %v619_v59, %v615_v2 }
  0x94   :  { %v621_v52 = vsub.f32 %v370_v13, %v620_v8  ;;  %v624_v47 = vsub.f32 %v419_v44, %v620_v8  ;;  %v628_v46 = vsub.f32 %v468_v40, %v620_v8  ;;  %v632_v55 = vsub.f32 %v517_v60, %v620_v8 }
  0x95   :  { %v636_v12 = vsub.f32 %v566_v53, %v620_v8  ;;  %v640_v61 = vsub.f32 %v615_v2, %v620_v8 }
  0x96   :  { %v622_v6 = vmul.f32 1.442695, %v621_v52  ;;  %v625_v11 = vmul.f32 1.442695, %v624_v47  ;;  %v629_v19 = vmul.f32 1.442695, %v628_v46 }
  0x97   :  { %v633_v9 = vmul.f32 1.442695, %v632_v55  ;;  %v637_v4 = vmul.f32 1.442695, %v636_v12  ;;  %v641_v25 = vmul.f32 1.442695, %v640_v61 }
  0x98   :  { %728 = vpow2.f32 %v622_v6 }
  0x99   :  { %730 = vpow2.f32 %v625_v11 }
  0x9a   :  { %732 = vpow2.f32 %v629_v19 }
  0x9b   :  { %734 = vpow2.f32 %v633_v9 }
  0x9c   :  { %736 = vpow2.f32 %v637_v4 }
  0x9d   :  { %738 = vpow2.f32 %v641_v25 }
  0x9e   :  { %v729_v20 = vpop.eup %728  ;;  %740 = vlog2.f32 %v318_v7 }
  0x9f   :  { %v731_v10 = vpop.eup %730 }
  0xa0   :  { %v733_v16 = vpop.eup %732  ;;  %v627_v13 = vadd.f32 %v731_v10, %v729_v20 }
  0xa1   :  { %v735_v44 = vpop.eup %734 }
  0xa2   :  { %v631_v23 = vadd.f32 %v733_v16, %v627_v13  ;;  %v737_v34 = vpop.eup %736 }
  0xa3   :  { %v739_v35 = vpop.eup %738 }
  0xa4   :  { %v635_v18 = vadd.f32 %v735_v44, %v631_v23  ;;  %v741_v29 = vpop.eup %740 }
  0xa5   :  { %v320_v28 = vmul.f32 0.6931472, %v741_v29 }
  0xa6   :  { %v639_v38 = vadd.f32 %v737_v34, %v635_v18 }
  0xa7   :  { %v321_v33 = vadd.f32 %v320_v28, %v1281_v42 }
  0xa8   :  { %v643_v21 = vadd.f32 %v739_v35, %v639_v38 }
  0xaa   :  { %742 = vlog2.f32 %v643_v21 }
  0xb0   :  { %v743_v15 = vpop.eup %742 }
  0xb1   :  { %v645_v40 = vmul.f32 0.6931472, %v743_v15 }
  0xb3   :  { %v646_v43 = vadd.f32 %v645_v40, %v620_v8 }
  0xb5   :  { %v647_v63 = vadd.f32 %v646_v43, %v321_v33 }
  0xb7   :  { %v649_v30 = vand.u32 2147483647, %v647_v63  ;;  %v648_v62 = vmax.f32 %v647_v63, 0.0 }
  0xb9   :  { %v650_v1 = vsub.f32 0.0, %v649_v30 }
  0xbb   :  { %v651_v56 = vmul.f32 1.442695, %v650_v1 }
  0xbd   :  { %744 = vpow2.f32 %v651_v56 }
  0xc3   :  { %v745_v5 = vpop.eup %744 }
  0xc4   :  { %v653_v31 = vadd.f32 1.0, %v745_v5  ;;  %v656_v60 = vmul.f32 -0.5, %v745_v5  ;;  %v659_v49 = vand.u32 2147483647, %v745_v5 }
  0xc6   :  { %746 = vlog2.f32 %v653_v31  ;;  %v657_v41 = vadd.f32 1.0, %v656_v60  ;;  %vm660_vm1 = vcmp.lt.f32.partialorder %v659_v49, 0.0004427343 }
  0xc8   :  { %v658_v26 = vmul.f32 %v745_v5, %v657_v41 }
  0xcc   :  { %v747_v50 = vpop.eup %746 }
  0xcd   :  { %v655_v51 = vmul.f32 0.6931472, %v747_v50 }
  0xcf   :  { %v661_v42 = vsel %vm660_vm1, %v658_v26, %v655_v51 }
  0xd0   :  { %v662_v53 = vadd.f32 %v661_v42, %v648_v62 }
  0xd2   :  { %663 = vst [vmem:[#allocation9] sm:$0x1] %v662_v53 }
  0xd3   :  { %674 = dma.vmem_to_hbm [thread:$0]  %s670_s4, 16, %s672_s19, [#allocation5]  }
  0xd4   :  { %848 = dma.done.wait [#allocation5], 16  }
  0xd5   :  { %849 = vsyncadd [#allocation5], 4294967280 }
  0xd6   :  { %679 = vsyncpa [#allocation4], 1 }
  0xd7   :  { %680 = vsyncpa [#allocation7], 1 }
  0xd8   :  { %681 = vsyncpa [#allocation5], 1 }

</bundles_post_ra>
